<compile_context>
chip_gen: v7x
topology: tpu7x:2x2x1
jax: 0.10.0
libtpu: 0.0.40
codegen_flags: <defaults>
</compile_context>

<pallas_src>
import functools

import jax
import jax.numpy as jnp
import numpy as np
from jax.experimental import pallas as pl
from jax.experimental.pallas import tpu as pltpu


# ------------------------------- kernel -------------------------------------

def _resblock_kernel(x_ref, m_ref, w1_ref, w2_ref, wb_ref, c1_ref, c2_ref,
                     ph_ref, o_ref, *, Rb):
    """One batch block.  Rb = Nb*(H+4) stacked, row-apron-padded input rows."""
    f32 = jnp.float32

    # ---- conv1 (3x3, pad=1): one MXU matmul per kernel row dy ---------------
    g = jnp.dot(x_ref[pl.ds(0, Rb - 2), :], w1_ref[0], preferred_element_type=f32)
    g = g + jnp.dot(x_ref[pl.ds(1, Rb - 2), :], w1_ref[1], preferred_element_type=f32)
    g = g + jnp.dot(x_ref[pl.ds(2, Rb - 2), :], w1_ref[2], preferred_element_type=f32)

    # bias + ReLU; the 0/1 column mask zeroes the conv-halo / inter-image
    # filler rows so they act as conv2's zero padding.
    h = (jnp.maximum(g + c1_ref[...], 0.0) * m_ref[...]).astype(jnp.bfloat16)

    # ---- conv2 (3x3, pad=1); W-direction avg-pool already folded into w2 ----
    y = jnp.dot(h[0:Rb - 4, :], w2_ref[0], preferred_element_type=f32)
    y = y + jnp.dot(h[1:Rb - 3, :], w2_ref[1], preferred_element_type=f32)
    y = y + jnp.dot(h[2:Rb - 2, :], w2_ref[2], preferred_element_type=f32)

    # ---- bypass (1x1 conv / identity, W-pool folded) + combined bias --------
    y = y + jnp.dot(x_ref[pl.ds(2, Rb - 4), :], wb_ref[...],
                    preferred_element_type=f32)
    y = y + c2_ref[...]

    # ---- H-direction avg-pool (0.25 * row pairs) / valid-row selection ------
    # One small f32 matmul doubles as per-image row extraction.  Single wide
    # lane-dense store.
    o_ref[...] = jnp.dot(ph_ref[...], y, preferred_element_type=f32).astype(o_ref.dtype)


# ------------------------------- wrapper ------------------------------------

def _pad_channels(c, width):
    """Smallest cp >= c such that (width * cp) % 128 == 0 (lane-dense fold)."""
    cp = c
    while (width * cp) % 128 != 0:
        cp += 1
    return cp


def first_resblock_discriminator(x_nchw, params, stride, block_n=None):
    """Pallas forward pass.  x_nchw: (N, Cin, H, W) float32 (PyTorch layout)."""
    assert stride in (1, 2), "only stride 1 (identity) or 2 (AvgPool2d(2,2))"
    N, Cin, H, W = x_nchw.shape
    Cout = params["w1"].shape[0]
    pool = stride != 1
    if pool:
        assert H % 2 == 0 and W % 2 == 0
    Ho, Wo = (H // 2, W // 2) if pool else (H, W)

    Cinp = _pad_channels(Cin, W)       # 4 -> 8   (W*Cinp  = 128)
    Coutp = _pad_channels(Cout, Wo)    # 8 -> 16  (Wo*Coutp = 128)
    K1, N1 = W * Cinp, W * Coutp       # conv1 operand / output widths
    N2 = Wo * Coutp                    # conv2/bypass (pool-folded) width

    # ---- batch blocking: Nb images per grid step -----------------------------
    if block_n is None:
        block_n = N                    # single block: no divisibility needed
        for nb in range(min(N, 8), 0, -1):
            if N % nb == 0 and (nb * (H + 4)) % 8 == 0 and (nb * Ho) % 8 == 0:
                block_n = nb
                break
    assert N % block_n == 0
    n_blocks = N // block_n
    Rb = block_n * (H + 4)

    # ---- input: NCHW -> lane-dense (rows, W*Cinp) with 2-row zero aprons -----
    x = jnp.transpose(x_nchw, (0, 2, 3, 1)).astype(jnp.float32)       # (N,H,W,Cin)
    x = jnp.pad(x, ((0, 0), (0, 0), (0, 0), (0, Cinp - Cin)))
    x = x.reshape(N, H, W * Cinp)
    x = jnp.pad(x, ((0, 0), (2, 2), (0, 0)))                          # row aprons
    xs = x.reshape(N * (H + 4), K1).astype(jnp.bfloat16)

    # ---- banded conv weights --------------------------------------------------
    # sel[dx, jp, j] = 1 iff jp == j + dx - 1  (W-edge zero-pad clipping built in)
    sel = np.zeros((3, W, W), np.float32)
    for dx in range(3):
        for j in range(W):
            jp = j + dx - 1
            if 0 <= jp < W:
                sel[dx, jp, j] = 1.0
    sel = jnp.asarray(sel)

    def banded(w_oikk, ci, cip, co, cop):
        # (O,I,3,3) -> (3, W*cip, W*cop):  B[dy, jp*cip+c, j*cop+o] = w[o,c,dy,jp-j+1]
        wt = jnp.transpose(w_oikk, (2, 3, 1, 0)).astype(jnp.float32)  # (dy,dx,c,o)
        wt = jnp.pad(wt, ((0, 0), (0, 0), (0, cip - ci), (0, cop - co)))
        B = jnp.einsum('xpj,yxco->ypcjo', sel, wt)                    # (3,W,cip,W,cop)
        return B.reshape(3, W * cip, W * cop)

    B1 = banded(params["w1"], Cin, Cinp, Cout, Coutp)                 # (3, K1, N1)
    B2 = banded(params["w2"], Cout, Coutp, Cout, Coutp)               # (3, N1, N1)

    # bypass: 1x1 conv (Cin != Cout) or identity, as a block-diagonal matrix.
    if Cin != Cout:
        wb = params["wb"][:, :, 0, 0]                                 # (Cout, Cin)
        bb = params["bb"].astype(jnp.float32)
    else:
        wb = jnp.eye(Cout, dtype=jnp.float32)
        bb = jnp.zeros((Cout,), jnp.float32)
    wbt = jnp.pad(jnp.transpose(wb).astype(jnp.float32),
                  ((0, Cinp - Cin), (0, Coutp - Cout)))               # (Cinp, Coutp)
    eyeW = jnp.asarray(np.eye(W, dtype=np.float32))
    Bb = jnp.einsum('pj,co->pcjo', eyeW, wbt).reshape(K1, N1)

    # ---- fold the W-direction average pool into conv2 / bypass ----------------
    b2c = params["b2"].astype(jnp.float32) + bb
    if pool:
        def fold_w(B):
            shp = B.shape[:-1]
            return B.reshape(*shp, Wo, 2, Coutp).sum(axis=-2).reshape(*shp, N2)
        B2, Bb = fold_w(B2), fold_w(Bb)
        b2c = 2.0 * b2c                         # each pooled column holds 2 biases

    B1 = B1.astype(jnp.bfloat16)
    B2 = B2.astype(jnp.bfloat16)
    Bb = Bb.astype(jnp.bfloat16)

    # ---- bias tiles (padded channels stay zero) --------------------------------
    c1 = jnp.tile(jnp.pad(params["b1"].astype(jnp.float32), (0, Coutp - Cout)),
                  (W,)).reshape(1, N1)
    c2 = jnp.tile(jnp.pad(b2c, (0, Coutp - Cout)), (Wo,)).reshape(1, N2)

    # ---- per-block row mask (conv halo rows & inter-image filler -> 0) ---------
    mrow = np.zeros((Rb - 2, 1), np.float32)
    for b in range(block_n):
        mrow[b * (H + 4) + 1: b * (H + 4) + 1 + H, 0] = 1.0
    mcol = jnp.asarray(mrow)

    # ---- H-pool (0.25 * row pairs) / valid-row selection matrix ----------------
    ph = np.zeros((block_n * Ho, Rb - 4), np.float32)
    for b in range(block_n):
        for io in range(Ho):
            if pool:
                ph[b * Ho + io, b * (H + 4) + 2 * io] = 0.25
                ph[b * Ho + io, b * (H + 4) + 2 * io + 1] = 0.25
            else:
                ph[b * Ho + io, b * (H + 4) + io] = 1.0
    ph = jnp.asarray(ph)

    kernel = functools.partial(_resblock_kernel, Rb=Rb)

    out_flat = pl.pallas_call(
        kernel,
        out_shape=jax.ShapeDtypeStruct((N * Ho, N2), jnp.float32),
        grid=(n_blocks,),
        in_specs=[
            pl.BlockSpec((Rb, K1), lambda n: (n, 0)),                  # stacked input
            pl.BlockSpec((Rb - 2, 1), lambda n: (0, 0)),               # row mask
            pl.BlockSpec((3, K1, N1), lambda n: (0, 0, 0)),            # conv1 banded
            pl.BlockSpec((3, N1, N2), lambda n: (0, 0, 0)),            # conv2 banded
            pl.BlockSpec((K1, N2), lambda n: (0, 0)),                  # bypass banded
            pl.BlockSpec((1, N1), lambda n: (0, 0)),                   # bias 1 tile
            pl.BlockSpec((1, N2), lambda n: (0, 0)),                   # bias 2+bypass
            pl.BlockSpec((block_n * Ho, Rb - 4), lambda n: (0, 0)),    # H-pool/select
        ],
        out_specs=pl.BlockSpec((block_n * Ho, N2), lambda n: (n, 0)),
        compiler_params=pltpu.CompilerParams(
            dimension_semantics=("parallel",),
            vmem_limit_bytes=32 * 1024 * 1024),
    )(xs, mcol, B1, B2, Bb, c1, c2, ph)

    # (N*Ho, Wo*Coutp) -> (N, Ho, Wo, Coutp) -> real channels -> NCHW
    out = out_flat.reshape(N, Ho, Wo, Coutp)[:, :, :, :Cout]
    return jnp.transpose(out, (0, 3, 1, 2))


# --------------------------- pure-JAX reference ------------------------------

def reference(x, params, stride):
    def conv(z, w, b, pad):
        y = jax.lax.conv_general_dilated(
            z, w, (1, 1), [(pad, pad), (pad, pad)],
            dimension_numbers=("NCHW", "OIHW", "NCHW"))
        return y + b[None, :, None, None]

    Cin, Cout = x.shape[1], params["w1"].shape[0]
    h = conv(x, params["w1"], params["b1"], 1)
    h = jnp.maximum(h, 0.0)
    h = conv(h, params["w2"], params["b2"], 1)
    bp = conv(x, params["wb"], params["bb"], 0) if Cin != Cout else x

    if stride != 1:
        def pool(z):
            s = jax.lax.reduce_window(z, 0.0, jax.lax.add,
                                      (1, 1, 2, 2), (1, 1, stride, stride),
                                      "VALID")
            return s / 4.0
        h, bp = pool(h), pool(bp)
    return h + bp


# ---------------------------------- main -------------------------------------

if __name__ == "__main__":
    in_ch, out_ch, stride = 4, 8, 2
    N, H, W = 2, 16, 16

    key = jax.random.PRNGKey(0)
    kx, k1, k2, k3, k4, k5, k6 = jax.random.split(key, 7)

    x = jax.random.normal(kx, (N, in_ch, H, W), jnp.float32)

    # deterministic synthetic parameters (PyTorch OIHW / (O,) layouts)
    params = {
        "w1": 0.1 * jax.random.normal(k1, (out_ch, in_ch, 3, 3), jnp.float32),
        "b1": 0.1 * jax.random.normal(k2, (out_ch,), jnp.float32),
        "w2": 0.1 * jax.random.normal(k3, (out_ch, out_ch, 3, 3), jnp.float32),
        "b2": 0.1 * jax.random.normal(k4, (out_ch,), jnp.float32),
        "wb": 0.1 * jax.random.normal(k5, (out_ch, in_ch, 1, 1), jnp.float32),
        "bb": 0.1 * jax.random.normal(k6, (out_ch,), jnp.float32),
    }

    out = first_resblock_discriminator(x, params, stride)
    out = jax.block_until_ready(out)

    ref = jax.block_until_ready(reference(x, params, stride))
    assert out.shape == ref.shape == (N, out_ch, H // stride, W // stride), out.shape
    np.testing.assert_allclose(np.asarray(out), np.asarray(ref),
                               atol=1e-2, rtol=1e-2)

    print("KERNEL_OK")
</pallas_src>

<mosaic_0001>
module attributes {stable_mosaic.version = 11 : i64} {
  func.func @_resblock_kernel(%arg0: i32, %arg1: memref<40x128xbf16, #tpu.memory_space<vmem>>, %arg2: memref<38x1xf32, #tpu.memory_space<vmem>>, %arg3: memref<3x128x256xbf16, #tpu.memory_space<vmem>>, %arg4: memref<3x256x128xbf16, #tpu.memory_space<vmem>>, %arg5: memref<128x128xbf16, #tpu.memory_space<vmem>>, %arg6: memref<1x256xf32, #tpu.memory_space<vmem>>, %arg7: memref<1x128xf32, #tpu.memory_space<vmem>>, %arg8: memref<16x36xf32, #tpu.memory_space<vmem>>, %arg9: memref<16x128xf32, #tpu.memory_space<vmem>>) attributes {dimension_semantics = [#tpu.dimension_semantics<parallel>], iteration_bounds = array<i64: 1>, scalar_prefetch = 0 : i64, scratch_operands = 0 : i64, tpu.core_type = #tpu.core_type<tc>, window_params = [{transform_indices = @transform_0, window_bounds = array<i64: 40, 128>}, {pipeline_mode = #tpu.pipeline_mode<synchronous>, transform_indices = @transform_1, window_bounds = array<i64: 38, 1>}, {pipeline_mode = #tpu.pipeline_mode<synchronous>, transform_indices = @transform_2, window_bounds = array<i64: 3, 128, 256>}, {pipeline_mode = #tpu.pipeline_mode<synchronous>, transform_indices = @transform_3, window_bounds = array<i64: 3, 256, 128>}, {pipeline_mode = #tpu.pipeline_mode<synchronous>, transform_indices = @transform_4, window_bounds = array<i64: 128, 128>}, {pipeline_mode = #tpu.pipeline_mode<synchronous>, transform_indices = @transform_5, window_bounds = array<i64: 1, 256>}, {pipeline_mode = #tpu.pipeline_mode<synchronous>, transform_indices = @transform_6, window_bounds = array<i64: 1, 128>}, {pipeline_mode = #tpu.pipeline_mode<synchronous>, transform_indices = @transform_7, window_bounds = array<i64: 16, 36>}, {transform_indices = @transform_8, window_bounds = array<i64: 16, 128>}]} {
    %c0 = arith.constant 0 : index
    %c0_0 = arith.constant 0 : index
    %0 = vector.load %arg1[%c0, %c0_0] : memref<40x128xbf16, #tpu.memory_space<vmem>>, vector<38x128xbf16>
    %c0_1 = arith.constant 0 : index
    %c0_2 = arith.constant 0 : index
    %c0_3 = arith.constant 0 : index
    %1 = vector.load %arg3[%c0_1, %c0_2, %c0_3] : memref<3x128x256xbf16, #tpu.memory_space<vmem>>, vector<1x128x256xbf16>
    %2 = vector.shape_cast %1 : vector<1x128x256xbf16> to vector<128x256xbf16>
    %cst = arith.constant dense<0.000000e+00> : vector<38x256xf32>
    %3 = tpu.matmul %0, %2, %cst {dimension_numbers = #tpu.dot_dimension_numbers<[1], [0], [0], [1], [0, 0, 1, 1], [], []>} : vector<38x128xbf16>, vector<128x256xbf16>, vector<38x256xf32> -> vector<38x256xf32>
    %c1 = arith.constant 1 : index
    %c0_4 = arith.constant 0 : index
    %4 = vector.load %arg1[%c1, %c0_4] : memref<40x128xbf16, #tpu.memory_space<vmem>>, vector<38x128xbf16>
    %c1_5 = arith.constant 1 : index
    %c0_6 = arith.constant 0 : index
    %c0_7 = arith.constant 0 : index
    %5 = vector.load %arg3[%c1_5, %c0_6, %c0_7] : memref<3x128x256xbf16, #tpu.memory_space<vmem>>, vector<1x128x256xbf16>
    %6 = vector.shape_cast %5 : vector<1x128x256xbf16> to vector<128x256xbf16>
    %cst_8 = arith.constant dense<0.000000e+00> : vector<38x256xf32>
    %7 = tpu.matmul %4, %6, %cst_8 {dimension_numbers = #tpu.dot_dimension_numbers<[1], [0], [0], [1], [0, 0, 1, 1], [], []>} : vector<38x128xbf16>, vector<128x256xbf16>, vector<38x256xf32> -> vector<38x256xf32>
    %8 = arith.addf %3, %7 : vector<38x256xf32>
    %c2 = arith.constant 2 : index
    %c0_9 = arith.constant 0 : index
    %9 = vector.load %arg1[%c2, %c0_9] : memref<40x128xbf16, #tpu.memory_space<vmem>>, vector<38x128xbf16>
    %c2_10 = arith.constant 2 : index
    %c0_11 = arith.constant 0 : index
    %c0_12 = arith.constant 0 : index
    %10 = vector.load %arg3[%c2_10, %c0_11, %c0_12] : memref<3x128x256xbf16, #tpu.memory_space<vmem>>, vector<1x128x256xbf16>
    %11 = vector.shape_cast %10 : vector<1x128x256xbf16> to vector<128x256xbf16>
    %cst_13 = arith.constant dense<0.000000e+00> : vector<38x256xf32>
    %12 = tpu.matmul %9, %11, %cst_13 {dimension_numbers = #tpu.dot_dimension_numbers<[1], [0], [0], [1], [0, 0, 1, 1], [], []>} : vector<38x128xbf16>, vector<128x256xbf16>, vector<38x256xf32> -> vector<38x256xf32>
    %13 = arith.addf %8, %12 : vector<38x256xf32>
    %c0_14 = arith.constant 0 : index
    %c0_15 = arith.constant 0 : index
    %14 = vector.load %arg6[%c0_14, %c0_15] : memref<1x256xf32, #tpu.memory_space<vmem>>, vector<1x256xf32>
    %15 = vector.broadcast %14 : vector<1x256xf32> to vector<38x256xf32>
    %16 = arith.addf %13, %15 : vector<38x256xf32>
    %cst_16 = arith.constant 0.000000e+00 : f32
    %17 = vector.broadcast %cst_16 : f32 to vector<38x256xf32>
    %18 = arith.maximumf %16, %17 : vector<38x256xf32>
    %c0_17 = arith.constant 0 : index
    %c0_18 = arith.constant 0 : index
    %19 = vector.load %arg2[%c0_17, %c0_18] : memref<38x1xf32, #tpu.memory_space<vmem>>, vector<38x1xf32>
    %20 = vector.broadcast %19 : vector<38x1xf32> to vector<38x256xf32>
    %21 = arith.mulf %18, %20 : vector<38x256xf32>
    %22 = arith.truncf %21 : vector<38x256xf32> to vector<38x256xbf16>
    %23 = vector.extract_strided_slice %22 {offsets = [0, 0], sizes = [36, 256], strides = [1, 1]} : vector<38x256xbf16> to vector<36x256xbf16>
    %c0_19 = arith.constant 0 : index
    %c0_20 = arith.constant 0 : index
    %c0_21 = arith.constant 0 : index
    %24 = vector.load %arg4[%c0_19, %c0_20, %c0_21] : memref<3x256x128xbf16, #tpu.memory_space<vmem>>, vector<1x256x128xbf16>
    %25 = vector.shape_cast %24 : vector<1x256x128xbf16> to vector<256x128xbf16>
    %cst_22 = arith.constant dense<0.000000e+00> : vector<36x128xf32>
    %26 = tpu.matmul %23, %25, %cst_22 {dimension_numbers = #tpu.dot_dimension_numbers<[1], [0], [0], [1], [0, 0, 1, 1], [], []>} : vector<36x256xbf16>, vector<256x128xbf16>, vector<36x128xf32> -> vector<36x128xf32>
    %27 = vector.extract_strided_slice %22 {offsets = [1, 0], sizes = [36, 256], strides = [1, 1]} : vector<38x256xbf16> to vector<36x256xbf16>
    %c1_23 = arith.constant 1 : index
    %c0_24 = arith.constant 0 : index
    %c0_25 = arith.constant 0 : index
    %28 = vector.load %arg4[%c1_23, %c0_24, %c0_25] : memref<3x256x128xbf16, #tpu.memory_space<vmem>>, vector<1x256x128xbf16>
    %29 = vector.shape_cast %28 : vector<1x256x128xbf16> to vector<256x128xbf16>
    %cst_26 = arith.constant dense<0.000000e+00> : vector<36x128xf32>
    %30 = tpu.matmul %27, %29, %cst_26 {dimension_numbers = #tpu.dot_dimension_numbers<[1], [0], [0], [1], [0, 0, 1, 1], [], []>} : vector<36x256xbf16>, vector<256x128xbf16>, vector<36x128xf32> -> vector<36x128xf32>
    %31 = arith.addf %26, %30 : vector<36x128xf32>
    %32 = vector.extract_strided_slice %22 {offsets = [2, 0], sizes = [36, 256], strides = [1, 1]} : vector<38x256xbf16> to vector<36x256xbf16>
    %c2_27 = arith.constant 2 : index
    %c0_28 = arith.constant 0 : index
    %c0_29 = arith.constant 0 : index
    %33 = vector.load %arg4[%c2_27, %c0_28, %c0_29] : memref<3x256x128xbf16, #tpu.memory_space<vmem>>, vector<1x256x128xbf16>
    %34 = vector.shape_cast %33 : vector<1x256x128xbf16> to vector<256x128xbf16>
    %cst_30 = arith.constant dense<0.000000e+00> : vector<36x128xf32>
    %35 = tpu.matmul %32, %34, %cst_30 {dimension_numbers = #tpu.dot_dimension_numbers<[1], [0], [0], [1], [0, 0, 1, 1], [], []>} : vector<36x256xbf16>, vector<256x128xbf16>, vector<36x128xf32> -> vector<36x128xf32>
    %36 = arith.addf %31, %35 : vector<36x128xf32>
    %c2_31 = arith.constant 2 : index
    %c0_32 = arith.constant 0 : index
    %37 = vector.load %arg1[%c2_31, %c0_32] : memref<40x128xbf16, #tpu.memory_space<vmem>>, vector<36x128xbf16>
    %c0_33 = arith.constant 0 : index
    %c0_34 = arith.constant 0 : index
    %38 = vector.load %arg5[%c0_33, %c0_34] : memref<128x128xbf16, #tpu.memory_space<vmem>>, vector<128x128xbf16>
    %cst_35 = arith.constant dense<0.000000e+00> : vector<36x128xf32>
    %39 = tpu.matmul %37, %38, %cst_35 {dimension_numbers = #tpu.dot_dimension_numbers<[1], [0], [0], [1], [0, 0, 1, 1], [], []>} : vector<36x128xbf16>, vector<128x128xbf16>, vector<36x128xf32> -> vector<36x128xf32>
    %40 = arith.addf %36, %39 : vector<36x128xf32>
    %c0_36 = arith.constant 0 : index
    %c0_37 = arith.constant 0 : index
    %41 = vector.load %arg7[%c0_36, %c0_37] : memref<1x128xf32, #tpu.memory_space<vmem>>, vector<1x128xf32>
    %42 = vector.broadcast %41 : vector<1x128xf32> to vector<36x128xf32>
    %43 = arith.addf %40, %42 : vector<36x128xf32>
    %c0_38 = arith.constant 0 : index
    %c0_39 = arith.constant 0 : index
    %44 = vector.load %arg8[%c0_38, %c0_39] : memref<16x36xf32, #tpu.memory_space<vmem>>, vector<16x36xf32>
    %cst_40 = arith.constant dense<0.000000e+00> : vector<16x128xf32>
    %45 = tpu.matmul %44, %43, %cst_40 {dimension_numbers = #tpu.dot_dimension_numbers<[1], [0], [0], [1], [0, 0, 1, 1], [], []>} : vector<16x36xf32>, vector<36x128xf32>, vector<16x128xf32> -> vector<16x128xf32>
    %c0_41 = arith.constant 0 : index
    %c0_42 = arith.constant 0 : index
    %46 = vector.load %arg9[%c0_41, %c0_42] : memref<16x128xf32, #tpu.memory_space<vmem>>, vector<16x128xf32>
    tpu.vector_store %arg9[%c0_41, %c0_42], %45 {strides = array<i32>} : memref<16x128xf32, #tpu.memory_space<vmem>>, vector<16x128xf32>,
    return
  }
  func.func @transform_0(%arg0: i32) -> (i32, i32) {
    %c0_i32 = arith.constant 0 : i32
    %c0_i32_0 = arith.constant 0 : i32
    return %arg0, %c0_i32 : i32, i32
  }
  func.func @transform_1(%arg0: i32) -> (i32, i32) {
    %c0_i32 = arith.constant 0 : i32
    %c0_i32_0 = arith.constant 0 : i32
    %c0_i32_1 = arith.constant 0 : i32
    return %c0_i32, %c0_i32_0 : i32, i32
  }
  func.func @transform_2(%arg0: i32) -> (i32, i32, i32) {
    %c0_i32 = arith.constant 0 : i32
    %c0_i32_0 = arith.constant 0 : i32
    %c0_i32_1 = arith.constant 0 : i32
    %c0_i32_2 = arith.constant 0 : i32
    return %c0_i32, %c0_i32_0, %c0_i32_1 : i32, i32, i32
  }
  func.func @transform_3(%arg0: i32) -> (i32, i32, i32) {
    %c0_i32 = arith.constant 0 : i32
    %c0_i32_0 = arith.constant 0 : i32
    %c0_i32_1 = arith.constant 0 : i32
    %c0_i32_2 = arith.constant 0 : i32
    return %c0_i32, %c0_i32_0, %c0_i32_1 : i32, i32, i32
  }
  func.func @transform_4(%arg0: i32) -> (i32, i32) {
    %c0_i32 = arith.constant 0 : i32
    %c0_i32_0 = arith.constant 0 : i32
    %c0_i32_1 = arith.constant 0 : i32
    return %c0_i32, %c0_i32_0 : i32, i32
  }
  func.func @transform_5(%arg0: i32) -> (i32, i32) {
    %c0_i32 = arith.constant 0 : i32
    %c0_i32_0 = arith.constant 0 : i32
    %c0_i32_1 = arith.constant 0 : i32
    return %c0_i32, %c0_i32_0 : i32, i32
  }
  func.func @transform_6(%arg0: i32) -> (i32, i32) {
    %c0_i32 = arith.constant 0 : i32
    %c0_i32_0 = arith.constant 0 : i32
    %c0_i32_1 = arith.constant 0 : i32
    return %c0_i32, %c0_i32_0 : i32, i32
  }
  func.func @transform_7(%arg0: i32) -> (i32, i32) {
    %c0_i32 = arith.constant 0 : i32
    %c0_i32_0 = arith.constant 0 : i32
    %c0_i32_1 = arith.constant 0 : i32
    return %c0_i32, %c0_i32_0 : i32, i32
  }
  func.func @transform_8(%arg0: i32) -> (i32, i32) {
    %c0_i32 = arith.constant 0 : i32
    %c0_i32_0 = arith.constant 0 : i32
    return %arg0, %c0_i32 : i32, i32
  }
}

</mosaic_0001>

<bundles_post_ra>
// kernel: tpu_custom_call.1
= control target key start
LH: loop header
LB: loop body
LE: loop exit
PB: predicated region body
PF: predicated region fallthrough
CT: control target
= control target key end

     0   :  { %13 = vsyncpa [#allocation3], 0  ;;  %s2474_s0 = inlined_call_operand.vmem [shape: bf16[40,128], index: 0, kind: input, shape index: {}]   ;;  %s2475_s1 = inlined_call_operand.vmem [shape: f32[38,1], index: 1, kind: input, shape index: {}]   ;;  %s2476_s2 = inlined_call_operand.hbm [shape: bf16[3,128,256], index: 2, kind: input, shape index: {}]   ;;  %s2477_s3 = inlined_call_operand.hbm [shape: bf16[3,256,128], index: 3, kind: input, shape index: {}]   ;;  %s2478_s4 = inlined_call_operand.hbm [shape: bf16[128,128], index: 4, kind: input, shape index: {}]   ;;  %s2479_s5 = inlined_call_operand.vmem [shape: f32[1,256], index: 5, kind: input, shape index: {}]   ;;  %s2480_s6 = inlined_call_operand.vmem [shape: f32[1,128], index: 6, kind: input, shape index: {}]   ;;  %s2481_s7 = inlined_call_operand.vmem [shape: f32[16,36], index: 7, kind: input, shape index: {}]   ;;  %s2482_s8 = inlined_call_operand.hbm [shape: f32[16,128], index: 8, kind: output, shape index: {}]  }
   0x1   :  { %14 = vsyncpa [#allocation6], 0 }
   0x2   :  { %15 = vsyncpa [#allocation4], 0  ;;  %s2134_s27 = smov [#allocation5]   ;;  %s2040_s9 = scalar_lea.hbm %s2477_s3, 6144 }
   0x3   :  { %s37_s28 = sshll.u32 %s2134_s27, 4  ;;  %p2041_p0 = scmp.ne.s32.totalorder %s2477_s3, %s2040_s9  ;;  %s38_s28 = int_to_ptr.vmem [resolvable:$true] %s37_s28 }
   0x4   :  { %p2044_p1 = scmp.lt.u32.totalorder %s2040_s9, %s2477_s3 }
   0x6   :  { %p2046_p2 = pnand %p2044_p1, %p2041_p0 }
   0x8   :  { %2049 = shalt.err (!%p2046_p2)
}
   0x9   :  { %s2050_s14 = scalar_lea.vmem %s38_s28, 6144  ;;  %p2055_p4 = scmp.lt.s32.totalorder %s38_s28, %s38_s28 }
   0xa   :  { %p2051_p3 = scmp.ne.s32.totalorder %s38_s28, %s2050_s14  ;;  %p2056_p5 = scmp.lt.s32.totalorder %s2050_s14, %s2050_s14 }
   0xc   :  { %p2057_p6 = por %p2056_p5, %p2055_p4 }
   0xe   :  { %p2058_p7 = pnand %p2057_p6, %p2051_p3 }
  0x10   :  { %2061 = shalt.err (!%p2058_p7)
}
  0x11   :  { %s2135_s15 = smov 64   ;;  %s2136_s16 = smov 4  }
  0x12   :  { %43 = dma.hbm_to_vmem [thread:$0]  %s2477_s3, 6144, %s38_s28, [#allocation6], %s2135_s15, %s2135_s15, %s2136_s16  }
  0x13   :  { %s2137_s19 = smov [#allocation2]   ;;  %s2062_s23 = scalar_lea.hbm %s2476_s2, 6144 }
  0x14   :  { %s25_s20 = sshll.u32 %s2137_s19, 4  ;;  %p2063_p8 = scmp.ne.s32.totalorder %s2476_s2, %s2062_s23  ;;  %s26_s20 = int_to_ptr.vmem [resolvable:$true] %s25_s20 }
  0x15   :  { %p2066_p9 = scmp.lt.u32.totalorder %s2062_s23, %s2476_s2 }
  0x17   :  { %p2068_p10 = pnand %p2066_p9, %p2063_p8 }
  0x19   :  { %2071 = shalt.err (!%p2068_p10)
}
  0x1a   :  { %s2072_s29 = scalar_lea.vmem %s26_s20, 6144  ;;  %p2077_p12 = scmp.lt.s32.totalorder %s26_s20, %s26_s20 }
  0x1b   :  { %p2073_p11 = scmp.ne.s32.totalorder %s26_s20, %s2072_s29  ;;  %p2078_p13 = scmp.lt.s32.totalorder %s2072_s29, %s2072_s29 }
  0x1d   :  { %p2079_p0 = por %p2078_p13, %p2077_p12 }
  0x1f   :  { %p2080_p1 = pnand %p2079_p0, %p2073_p11 }
  0x21   :  { %2083 = shalt.err (!%p2080_p1)
}
  0x22   :  { %s2138_s3 = smov 128   ;;  %s2139_s28 = smov 8  }
  0x23   :  { %31 = dma.hbm_to_vmem [thread:$0]  %s2476_s2, 6144, %s26_s20, [#allocation3], %s2138_s3, %s2138_s3, %s2139_s28  }
  0x24   :  { %s2140_s10 = smov [#allocation7]   ;;  %s2084_s14 = scalar_lea.hbm %s2478_s4, 1024 }
  0x25   :  { %s49_s11 = sshll.u32 %s2140_s10, 4  ;;  %p2085_p2 = scmp.ne.s32.totalorder %s2478_s4, %s2084_s14  ;;  %s50_s11 = int_to_ptr.vmem [resolvable:$true] %s49_s11 }
  0x26   :  { %p2088_p3 = scmp.lt.u32.totalorder %s2084_s14, %s2478_s4 }
  0x28   :  { %p2090_p4 = pnand %p2088_p3, %p2085_p2 }
  0x2a   :  { %2093 = shalt.err (!%p2090_p4)
}
  0x2b   :  { %s2094_s22 = scalar_lea.vmem %s50_s11, 1024  ;;  %p2099_p6 = scmp.lt.s32.totalorder %s50_s11, %s50_s11 }
  0x2c   :  { %p2095_p5 = scmp.ne.s32.totalorder %s50_s11, %s2094_s22  ;;  %p2100_p7 = scmp.lt.s32.totalorder %s2094_s22, %s2094_s22 }
  0x2e   :  { %p2101_p8 = por %p2100_p7, %p2099_p6 }
  0x30   :  { %p2102_p9 = pnand %p2101_p8, %p2095_p5 }
  0x32   :  { %2105 = shalt.err (!%p2102_p9)
}
  0x33   :  { %55 = dma.hbm_to_vmem [thread:$0]  %s2478_s4, 1024, %s50_s11, [#allocation6], %s2135_s15, %s2135_s15, %s2136_s16  }
  0x34   :  { %2128 = dma.done.wait [#allocation3], 6144  }
  0x35   :  { %2129 = vsyncadd [#allocation3], 4294961152 }
  0x36   :  { %2130 = dma.done.wait [#allocation6], 7168  }
  0x37   :  { %2131 = vsyncadd [#allocation6], 4294960128  ;;  %v2141_v0 = vmov 0   ;;  %v1907_v1 = vld [vmem:[#allocation2 + $0x84] ss:$8 sps:$4 sm:$0xff]   ;;  %v654_v39 = vld [vmem:[%s2475_s1 + $0x10] sm:$0xff] }
  0x38   :  { %263 = vmatprep.mubr.bf16.mxu0 %v2141_v0  ;;  %1905 = vset.pattern.permute.xlu0 %v2141_v0  ;;  %v1909_v2 = vld [vmem:[#allocation2 + $0x80] ss:$8 sps:$4 sm:$0xff]   ;;  %v1910_v3 = vld [vmem:[#allocation2 + $0x94] ss:$8 sps:$4 sm:$0xff]   ;;  %v1912_v4 = vld [vmem:[#allocation2 + $0x90] ss:$8 sps:$4 sm:$0xff]  }
  0x39   :  { %1906 = vset.pattern.permute.xlu1 %v2141_v0  ;;  %231 = vmatprep.subr.bf16.mxu0 %v1907_v1  ;;  %v1913_v5 = vld [vmem:[#allocation2 + $0xa4] ss:$8 sps:$4 sm:$0xff]   ;;  %v1915_v6 = vld [vmem:[#allocation2 + $0xa0] ss:$8 sps:$4 sm:$0xff]   ;;  %v1916_v7 = vld [vmem:[#allocation2 + $0xb4] ss:$8 sps:$4 sm:$0xff]  }
  0x3a   :  { %232 = vmatpush1.bf16.msra.mxu0 %v1909_v2  ;;  %v1918_v8 = vld [vmem:[#allocation2 + $0xb0] ss:$8 sps:$4 sm:$0xff]   ;;  %v1919_v9 = vld [vmem:[#allocation2 + $0xc4] ss:$8 sps:$4 sm:$0xff]   ;;  %v72_v10 = vld [vmem:[%s2474_s0] sm:$0xf]  ;;  %669 = vperm.xlu1 %1906, %v654_v39  }
  0x3b   :  { %233 = vmatprep.subr.bf16.mxu0 %v1910_v3  ;;  %v2244_v11 = vld [vmem:[%s2474_s0 + $0x4] sm:$0xf]  ;;  %v1921_v12 = vld [vmem:[#allocation2 + $0xc0] ss:$8 sps:$4 sm:$0xff]   ;;  %v1922_v14 = vld [vmem:[#allocation2 + $0xd4] ss:$8 sps:$4 sm:$0xff]  }
  0x3c   :  { %v2247_v13 = vcombine.low %v72_v10, %v2244_v11  ;;  %v1924_v15 = vld [vmem:[#allocation2 + $0xd0] ss:$8 sps:$4 sm:$0xff]   ;;  %v2252_v16 = vld [vmem:[%s2474_s0 + $0x8] sm:$0xff]   ;;  %v1928_v23 = vld [vmem:[#allocation2 + $0xf4] ss:$8 sps:$4 sm:$0xff]   ;;  %vm460_vm1 = vcmask 1046528  }
  0x3d   :  { %v1925_v18 = vld [vmem:[#allocation2 + $0xe4] ss:$8 sps:$4 sm:$0xff]   ;;  %v1927_v19 = vld [vmem:[#allocation2 + $0xe0] ss:$8 sps:$4 sm:$0xff]   ;;  %v133_v22 = vshll.u32 %v2252_v16, 16  ;;  %v137_v31 = vshrl.u32 %v2252_v16, 16 }
  0x3e   :  { %234 = vmatpush1.bf16.msra.mxu0 %v1912_v4  ;;  %v128_v17 = vshll.u32 %v2247_v13, 16  ;;  %v126_v20 = vshrl.u32 %v2247_v13, 16  ;;  %v1930_v24 = vld [vmem:[#allocation2 + $0xf0] ss:$8 sps:$4 sm:$0xff]   ;;  %v1933_v28 = vld [vmem:[#allocation2 + $0x4] ss:$8 sps:$4 sm:$0xff]  }
  0x3f   :  { %235 = vmatprep.subr.bf16.mxu0 %v1913_v5  ;;  %v135_v26 = vrot.slane %v133_v22, 1  ;;  %v2260_v27 = vld [vmem:[%s2474_s0 + $0x10] ss:$0 sps:$4 sm:$0xff]   ;;  %vm124_vm0 = vsmask.f32 7424  ;;  %v652_v37 = vld [vmem:[%s2475_s1] sm:$0xff] }
  0x40   :  { %v130_v21 = vrot.slane %v128_v17, 1  ;;  %v1931_v29 = vld [vmem:[#allocation2] ss:$8 sps:$4 sm:$0xff]   ;;  %v141_v32 = vshll.u32 %v2260_v27, 16  ;;  %v1938_v33 = vld [vmem:[#allocation2 + $0x14] ss:$8 sps:$4 sm:$0xff]   ;;  %659 = vperm.xlu0 %1905, %v652_v37  }
  0x41   :  { %v1936_v34 = vld [vmem:[#allocation2 + $0x10] ss:$8 sps:$4 sm:$0xff]   ;;  %v139_v35 = vor.u32 %v137_v31, %v135_v26  ;;  %v1941_v38 = vld [vmem:[#allocation2 + $0x24] ss:$8 sps:$4 sm:$0xff]   ;;  %v1939_v40 = vld [vmem:[#allocation2 + $0x20] ss:$8 sps:$4 sm:$0xff]  }
  0x42   :  { %236 = vmatpush1.bf16.msra.mxu0 %v1915_v6  ;;  %v131_v25 = vor.u32 %v130_v21, %v126_v20  ;;  %v143_v36 = vrot.slane %v141_v32, 1  ;;  %v653_v41 = vld [vmem:[%s2475_s1 + $0x8] sm:$0xff]  ;;  %v1944_v42 = vld [vmem:[#allocation2 + $0x34] ss:$8 sps:$4 sm:$0xff]   ;;  %v145_v43 = vshrl.u32 %v2260_v27, 16  ;;  %v2330_v39 = vld [vmem:[#allocation7 + $0x20] sm:$0xff]  }
  0x43   :  { %237 = vmatprep.subr.bf16.mxu0 %v1916_v7  ;;  %v655_v44 = vld [vmem:[%s2475_s1 + $0x18] sm:$0xff]  ;;  %v656_v46 = vld [vmem:[%s2475_s1 + $0x20] sm:$0x3f]  ;;  %v2292_v3 = vld [vmem:[%s2474_s0 + $0x10] ss:$0 sps:$4 sm:$0x77]  }
  0x44   :  { %v136_v30 = vsel %vm124_vm0, %v131_v25, %v135_v26  ;;  %v144_v45 = vsel %vm124_vm0, %v139_v35, %v143_v36  ;;  %664 = vperm.xlu0 %1905, %v653_v41   ;;  %v1942_v47 = vld [vmem:[#allocation2 + $0x30] ss:$8 sps:$4 sm:$0xff]   ;;  %674 = vperm.xlu1 %1906, %v655_v44   ;;  %v1948_v48 = vld [vmem:[#allocation2 + $0x44] ss:$8 sps:$4 sm:$0xff]   ;;  %v1946_v49 = vld [vmem:[#allocation2 + $0x40] ss:$8 sps:$4 sm:$0xff]   ;;  %v147_v51 = vor.u32 %v145_v43, %v143_v36 }
  0x45   :  { %v1951_v50 = vld [vmem:[#allocation2 + $0x54] ss:$8 sps:$4 sm:$0xff]   ;;  %v1949_v52 = vld [vmem:[#allocation2 + $0x50] ss:$8 sps:$4 sm:$0xff]   ;;  %v1954_v53 = vld [vmem:[#allocation2 + $0x64] ss:$8 sps:$4 sm:$0xff]  }
  0x46   :  { %238 = vmatpush1.bf16.msra.mxu0 %v1918_v8  ;;  %v1952_v54 = vld [vmem:[#allocation2 + $0x60] ss:$8 sps:$4 sm:$0xff]   ;;  %v1957_v55 = vld [vmem:[#allocation2 + $0x74] ss:$8 sps:$4 sm:$0xff]   ;;  %v1955_v56 = vld [vmem:[#allocation2 + $0x70] ss:$8 sps:$4 sm:$0xff]  }
  0x47   :  { %239 = vmatprep.subr.bf16.mxu0 %v1919_v9  ;;  %v1960_v57 = vld [vmem:[#allocation2 + $0x104] ss:$8 sps:$4 sm:$0xff]   ;;  %v1958_v58 = vld [vmem:[#allocation2 + $0x100] ss:$8 sps:$4 sm:$0xff]   ;;  %v1963_v59 = vld [vmem:[#allocation2 + $0x114] ss:$8 sps:$4 sm:$0xff]  }
  0x48   :  { %679 = vperm.xlu0 %1905, %v656_v46   ;;  %v1961_v60 = vld [vmem:[#allocation2 + $0x110] ss:$8 sps:$4 sm:$0xff]   ;;  %v1966_v61 = vld [vmem:[#allocation2 + $0x124] ss:$8 sps:$4 sm:$0xff]   ;;  %v1964_v62 = vld [vmem:[#allocation2 + $0x120] ss:$8 sps:$4 sm:$0xff]  }
  0x49   :  { %v1969_v63 = vld [vmem:[#allocation2 + $0x134] ss:$8 sps:$4 sm:$0xff]   ;;  %v1967_v1 = vld [vmem:[#allocation2 + $0x130] ss:$8 sps:$4 sm:$0xff]   ;;  %v1973_v2 = vld [vmem:[#allocation2 + $0x144] ss:$8 sps:$4 sm:$0xff]  }
  0x4a   :  { %240 = vmatpush1.bf16.msra.mxu0 %v1921_v12  ;;  %v1971_v4 = vld [vmem:[#allocation2 + $0x140] ss:$8 sps:$4 sm:$0xff]   ;;  %v1976_v5 = vld [vmem:[#allocation2 + $0x154] ss:$8 sps:$4 sm:$0xff]   ;;  %v1974_v6 = vld [vmem:[#allocation2 + $0x150] ss:$8 sps:$4 sm:$0xff]  }
  0x4b   :  { %241 = vmatprep.subr.bf16.mxu0 %v1922_v14  ;;  %v1979_v7 = vld [vmem:[#allocation2 + $0x164] ss:$8 sps:$4 sm:$0xff]   ;;  %v439_v8 = vld [vmem:[%s2474_s0] sm:$0xe]  ;;  %v1982_v12 = vld [vmem:[#allocation2 + $0x174] ss:$8 sps:$4 sm:$0xff]  }
  0x4c   :  { %v1977_v9 = vld [vmem:[#allocation2 + $0x160] ss:$8 sps:$4 sm:$0xff]   ;;  %v1616_v10 = vcombine.low %v439_v8, %v2244_v11  ;;  %v464_v11 = vrot.slane %v2260_v27, 1  ;;  %v1988_v22 = vld [vmem:[#allocation5 + $0xd0] sm:$0xff]   ;;  %v1991_v25 = vld [vmem:[#allocation5 + $0x98] sm:$0xff]   ;;  %v2142_v35 = vmov 0.0  }
  0x4d   :  { %v1986_v20 = vld [vmem:[#allocation5 + $0xc8] sm:$0xff]   ;;  %v1992_v26 = vld [vmem:[#allocation5 + $0xe0] sm:$0xff]   ;;  %v1998_v31 = vld [vmem:[#allocation5 + $0xf8] sm:$0xff]   ;;  %vm2143_vm2 = vmmov 0   ;;  %vm1474_vm3 = vcmask 293888   ;;  %vm1481_vm4 = vcmask 1043456  }
  0x4e   :  { %242 = vmatpush1.bf16.msra.mxu0 %v1924_v15  ;;  %v461_v14 = vrot.slane %v1616_v10, 1  ;;  %v2301_v15 = vrot.slane %v2252_v16, 1  ;;  %v1987_v21 = vld [vmem:[#allocation5 + $0x88] sm:$0xff]   ;;  %v1993_v27 = vld [vmem:[#allocation5 + $0xa0] sm:$0xff]   ;;  %v1999_v32 = vld [vmem:[#allocation5 + $0xb8] sm:$0xff]   ;;  %s2144_s23 = smov [#allocation8]  }
  0x4f   :  { %243 = vmatprep.subr.bf16.mxu0 %v1925_v18  ;;  %v2318_v36 = vld [vmem:[#allocation7 + $0x8] sm:$0xff]   ;;  %v2322_v37 = vld [vmem:[#allocation7 + $0x10] sm:$0xff]   ;;  %v2342_v46 = vld [vmem:[#allocation7 + $0x38] sm:$0xff]   ;;  %s1567_s24 = sshll.u32 %s2144_s23, 4  ;;  %s1568_s24 = int_to_ptr.vmem [resolvable:$true] %s1567_s24 }
  0x50   :  { %v2305_v17 = vsel %vm460_vm1, %v461_v14, %v2301_v15  ;;  %v465_v18 = vsel %vm460_vm1, %v2301_v15, %v464_v11  ;;  %v2334_v43 = vld [vmem:[#allocation7 + $0x28] sm:$0xff]   ;;  %s2106_s25 = scalar_lea.vmem %s1568_s24, 256  ;;  %p2111_p11 = scmp.lt.s32.totalorder %s1568_s24, %s1568_s24 }
  0x51   :  { %p2107_p10 = scmp.ne.s32.totalorder %s1568_s24, %s2106_s25  ;;  %p2112_p12 = scmp.lt.s32.totalorder %s2106_s25, %s2106_s25 }
  0x52   :  { %244 = vmatpush1.bf16.msra.mxu0 %v1927_v19  ;;  %v1985_v19 = vld [vmem:[#allocation5 + $0x80] sm:$0xff]  }
  0x53   :  { %245 = vmatprep.subr.bf16.mxu0 %v1928_v23  ;;  %v1989_v23 = vld [vmem:[#allocation5 + $0x90] sm:$0xff]   ;;  %p2113_p13 = por %p2112_p12, %p2111_p11 }
  0x55   :  { %p2114_p0 = pnand %p2113_p13, %p2107_p10 }
  0x56   :  { %246 = vmatpush1.bf16.msra.mxu0 %v1930_v24  ;;  %v1990_v24 = vld [vmem:[#allocation5 + $0xd8] sm:$0xff]  }
  0x57   :  { %378 = vmatprep.subr.bf16.mxu0 %v1933_v28  ;;  %v1995_v28 = vld [vmem:[#allocation5 + $0xa8] sm:$0xff]  }
  0x59   :  { %264 = vmatmul.mubr.bf16.vlgmr.msra.gmra.mrb[0].mxu0 %v136_v30  ;;  %v1997_v30 = vld [vmem:[#allocation5 + $0xb0] sm:$0xff]  }
  0x5a   :  { %379 = vmatpush1.bf16.msra.mxu0 %v1931_v29  ;;  %273 = vmatprep.mubr.bf16.mxu0 %v2141_v0  ;;  %v1996_v29 = vld [vmem:[#allocation5 + $0xf0] sm:$0xff]  }
  0x5b   :  { %380 = vmatprep.subr.bf16.mxu0 %v1938_v33  ;;  %v2000_v33 = vld [vmem:[#allocation5 + $0x40] sm:$0xff]  }
  0x5e   :  { %381 = vmatpush1.bf16.msra.mxu0 %v1936_v34  ;;  %v2313_v34 = vld [vmem:[#allocation7] sm:$0xff]  }
  0x5f   :  { %382 = vmatprep.subr.bf16.mxu0 %v1941_v38  ;;  %v2326_v38 = vld [vmem:[#allocation7 + $0x18] sm:$0xff]  }
  0x61   :  { %274 = vmatmul.mubr.bf16.gmra.mrb[4].mxu0 %v144_v45  ;;  %v2338_v45 = vld [vmem:[#allocation7 + $0x30] sm:$0xff]  }
  0x62   :  { %383 = vmatpush1.bf16.msra.mxu0 %v1939_v40  ;;  %283 = vmatprep.mubr.bf16.mxu0 %v2141_v0 }
  0x63   :  { %384 = vmatprep.subr.bf16.mxu0 %v1944_v42 }
  0x66   :  { %385 = vmatpush1.bf16.msra.mxu0 %v1942_v47  ;;  %v1347_v47 = vrot.slane %v2292_v3, 1 }
  0x67   :  { %386 = vmatprep.subr.bf16.mxu0 %v1948_v48 }
  0x68   :  { %v1348_v48 = vsel %vm460_vm1, %v2301_v15, %v1347_v47 }
  0x69   :  { %284 = vmatmul.mubr.bf16.gmra.mrb[8].mxu0 %v147_v51 }
  0x6a   :  { %387 = vmatpush1.bf16.msra.mxu0 %v1946_v49  ;;  %410 = vmatprep.mubr.bf16.mxu0 %v2141_v0 }
  0x6b   :  { %388 = vmatprep.subr.bf16.mxu0 %v1951_v50 }
  0x6e   :  { %389 = vmatpush1.bf16.msra.mxu0 %v1949_v52  ;;  %v622_v52 = vlaneseq }
  0x6f   :  { %390 = vmatprep.subr.bf16.mxu0 %v1954_v53 }
  0x72   :  { %391 = vmatpush1.bf16.msra.mxu0 %v1952_v54 }
  0x73   :  { %392 = vmatprep.subr.bf16.mxu0 %v1957_v55 }
  0x76   :  { %393 = vmatpush1.bf16.msra.mxu0 %v1955_v56  ;;  %v623_v56 = vshrl.u32 %v622_v52, 7 }
  0x77   :  { %549 = vmatprep.subr.bf16.mxu0 %v1960_v57 }
  0x78   :  { %v624_v57 = vsub.s32 0, %v623_v56 }
  0x79   :  { %411 = vmatmul.mubr.bf16.vlgmr.msra.gmra.mrb[0].mxu0 %v2247_v13  ;;  %v1980_v13 = vld [vmem:[#allocation2 + $0x170] ss:$8 sps:$4 sm:$0xff]  }
  0x7a   :  { %550 = vmatpush1.bf16.msra.mxu0 %v1958_v58  ;;  %420 = vmatprep.mubr.bf16.mxu0 %v2141_v0  ;;  %v620_v58 = vld [vmem:[%s2479_s5] sm:$0x3] }
  0x7b   :  { %551 = vmatprep.subr.bf16.mxu0 %v1963_v59  ;;  %v628_v59 = vsub.s32 1, %v623_v56 }
  0x7e   :  { %552 = vmatpush1.bf16.msra.mxu0 %v1961_v60  ;;  %v625_v60 = vrot.slane %v620_v58, %v624_v57 }
  0x7f   :  { %553 = vmatprep.subr.bf16.mxu0 %v1966_v61 }
  0x81   :  { %421 = vmatmul.mubr.bf16.gmra.mrb[4].mxu0 %v2252_v16  ;;  %v1984_v16 = vld [vmem:[#allocation5 + $0xc0] sm:$0xff]  }
  0x82   :  { %554 = vmatpush1.bf16.msra.mxu0 %v1964_v62  ;;  %430 = vmatprep.mubr.bf16.mxu0 %v2141_v0  ;;  %v629_v62 = vrot.slane %v620_v58, %v628_v59 }
  0x83   :  { %555 = vmatprep.subr.bf16.mxu0 %v1969_v63  ;;  %1693 = vmatprep.subr.bf16.mxu1 %v1984_v16 }
  0x84   :  { %1694 = vmatpush3.bf16.msra.mxu1 %v1985_v19 }
  0x85   :  { %1695 = vmatprep.subr.bf16.mxu1 %v1986_v20 }
  0x86   :  { %556 = vmatpush1.bf16.msra.mxu0 %v1967_v1 }
  0x87   :  { %557 = vmatprep.subr.bf16.mxu0 %v1973_v2 }
  0x88   :  { %1696 = vmatpush3.bf16.msra.mxu1 %v1987_v21 }
  0x89   :  { %431 = vmatmul.mubr.bf16.gmra.mrb[12].mxu0 %v2292_v3  ;;  %1697 = vmatprep.subr.bf16.mxu1 %v1988_v22 }
  0x8a   :  { %558 = vmatpush1.bf16.msra.mxu0 %v1971_v4  ;;  %581 = vmatprep.mubr.bf16.mxu0 %v2141_v0 }
  0x8b   :  { %559 = vmatprep.subr.bf16.mxu0 %v1976_v5 }
  0x8c   :  { %1698 = vmatpush3.bf16.msra.mxu1 %v1989_v23 }
  0x8d   :  { %1699 = vmatprep.subr.bf16.mxu1 %v1990_v24 }
  0x8e   :  { %560 = vmatpush1.bf16.msra.mxu0 %v1974_v6 }
  0x8f   :  { %561 = vmatprep.subr.bf16.mxu0 %v1979_v7 }
  0x90   :  { %1700 = vmatpush3.bf16.msra.mxu1 %v1991_v25 }
  0x91   :  { %1701 = vmatprep.subr.bf16.mxu1 %v1992_v26 }
  0x92   :  { %562 = vmatpush1.bf16.msra.mxu0 %v1977_v9 }
  0x93   :  { %563 = vmatprep.subr.bf16.mxu0 %v1982_v12 }
  0x94   :  { %1702 = vmatpush3.bf16.msra.mxu1 %v1993_v27 }
  0x96   :  { %564 = vmatpush1.bf16.msra.mxu0 %v1980_v13 }
  0x97   :  { %1813 = vmatprep.subr.bf16.mxu0 %v2142_v35 }
  0x99   :  { %582 = vmatmul.mubr.bf16.vlgmr.msra.gmra.mrb[0].mxu0 %v2305_v17 }
  0x9a   :  { %591 = vmatprep.mubr.bf16.mxu0 %v2141_v0  ;;  %1814 = vmatpush3.bf16.msra.mxu0 %v2313_v34 }
  0x9b   :  { %1815 = vmatprep.subr.bf16.mxu0 %v2142_v35 }
  0x9e   :  { %1816 = vmatpush3.bf16.msra.mxu0 %v2318_v36 }
  0x9f   :  { %1817 = vmatprep.subr.bf16.mxu0 %v2142_v35 }
  0xa1   :  { %592 = vmatmul.mubr.bf16.gmra.mrb[4].mxu0 %v465_v18 }
  0xa2   :  { %601 = vmatprep.mubr.bf16.mxu0 %v2141_v0  ;;  %v1994_v0 = vld [vmem:[#allocation5 + $0xe8] sm:$0xff]   ;;  %1818 = vmatpush3.bf16.msra.mxu0 %v2322_v37 }
  0xa3   :  { %1703 = vmatprep.subr.bf16.mxu1 %v1994_v0  ;;  %1819 = vmatprep.subr.bf16.mxu0 %v2142_v35 }
  0xa4   :  { %1704 = vmatpush3.bf16.msra.mxu1 %v1995_v28 }
  0xa5   :  { %1705 = vmatprep.subr.bf16.mxu1 %v1996_v29 }
  0xa6   :  { %1820 = vmatpush3.bf16.msra.mxu0 %v2326_v38 }
  0xa7   :  { %1821 = vmatprep.subr.bf16.mxu0 %v2142_v35 }
  0xa8   :  { %1706 = vmatpush3.bf16.msra.mxu1 %v1997_v30 }
  0xa9   :  { %602 = vmatmul.mubr.bf16.gmra.mrb[16].mxu0 %v464_v11  ;;  %1707 = vmatprep.subr.bf16.mxu1 %v1998_v31 }
  0xaa   :  { %1822 = vmatpush3.bf16.msra.mxu0 %v2330_v39  ;;  %1829 = vmatprep.mubr.msk.bf16.mxu0 %vm2143_vm2, %v2142_v35 }
  0xab   :  { %1823 = vmatprep.subr.bf16.mxu0 %v2142_v35 }
  0xac   :  { %1708 = vmatpush3.bf16.msra.mxu1 %v1999_v32 }
  0xad   :  { %1727 = vmatprep.subr.bf16.mxu1 %v2000_v33 }
  0xae   :  { %1824 = vmatpush3.bf16.msra.mxu0 %v2334_v43 }
  0xaf   :  { %1825 = vmatprep.subr.bf16.mxu0 %v2142_v35 }
  0xb2   :  { %1826 = vmatpush3.bf16.msra.mxu0 %v2338_v45 }
  0xb3   :  { %1827 = vmatprep.subr.bf16.mxu0 %v2142_v35 }
  0xb6   :  { %1828 = vmatpush3.bf16.msra.mxu0 %v2342_v46 }
  0xb9   :  { %1830 = vmatmul.mubr.bf16.vlgmr.msra.gmra.mrb[20].mxu0 %v2305_v17  ;;  %v670_v16 = vpop.permute.xlu1 %669 }
  0xba   :  { %1833 = vmatprep.mubr.msk.bf16.mxu0 %vm2143_vm2, %v2142_v35 }
  0xbf   :  { %v660_v61 = vpop.permute.xlu0 %659 }
  0xc1   :  { %1834 = vmatmul.mubr.bf16.gmra.mrb[24].mxu0 %v1348_v48 }
  0xc3   :  { %v665_v12 = vpop.permute.xlu0 %664  ;;  %v675_v32 = vpop.permute.xlu1 %674 }
 0x13c   :  { %v285_v40 = vpop.f32.mrb[8].mxu0 }
 0x13d   :  { %v287_v41 = vpop.f32.mrb[9].mxu0 }
 0x13e   :  { %v289_v42 = vpop.f32.mrb[10].mxu0 }
 0x13f   :  { %v290_v44 = vpop.f32.mrb[11].mxu0 }
 0x15c   :  { %v432_v49 = vpop.f32.mrb[12].mxu0 }
 0x15d   :  { %v433_v50 = vadd.f32 %v432_v49, %v285_v40  ;;  %v434_v51 = vpop.f32.mrb[13].mxu0 }
 0x15e   :  { %v435_v53 = vadd.f32 %v434_v51, %v287_v41  ;;  %v436_v54 = vpop.f32.mrb[14].mxu0 }
 0x15f   :  { %v437_v55 = vpop.f32.mrb[15].mxu0 }
 0x16c   :  { %v583_v63 = vpop.f32.mrb[0].mxu0 }
 0x16d   :  { %v632_v1 = vadd.f32 %v625_v60, %v583_v63  ;;  %v585_v2 = vpop.f32.mrb[1].mxu0 }
 0x16e   :  { %v633_v4 = vadd.f32 %v629_v62, %v585_v2  ;;  %v587_v5 = vpop.f32.mrb[2].mxu0 }
 0x16f   :  { %v642_v6 = vmax.f32 %v632_v1, 0.0  ;;  %v634_v7 = vadd.f32 %v625_v60, %v587_v5  ;;  %v589_v8 = vpop.f32.mrb[3].mxu0 }
 0x170   :  { %v643_v9 = vmax.f32 %v633_v4, 0.0  ;;  %v635_v10 = vadd.f32 %v629_v62, %v589_v8 }
 0x171   :  { %v644_v13 = vmax.f32 %v634_v7, 0.0  ;;  %v682_v15 = vmul.f32 %v660_v61, %v642_v6 }
 0x172   :  { %v645_v14 = vmax.f32 %v635_v10, 0.0  ;;  %v683_v11 = vmul.f32 %v660_v61, %v643_v9 }
 0x173   :  { %v684_v17 = vmul.f32 %v665_v12, %v644_v13 }
 0x174   :  { %v685_v18 = vmul.f32 %v665_v12, %v645_v14  ;;  %v593_v19 = vpop.f32.mrb[4].mxu0 }
 0x175   :  { %v2358_v20 = vpack.c.bf16 %v684_v17, %v682_v15  ;;  %v636_v21 = vadd.f32 %v625_v60, %v593_v19  ;;  %v595_v22 = vpop.f32.mrb[5].mxu0 }
 0x176   :  { %v2360_v23 = vpack.c.bf16 %v685_v18, %v683_v11  ;;  %v637_v24 = vadd.f32 %v629_v62, %v595_v22  ;;  %v597_v25 = vpop.f32.mrb[6].mxu0  ;;  %v2002_v22 = vld [vmem:[#allocation5 + $0x48] sm:$0xff]  }
 0x177   :  { %v646_v26 = vmax.f32 %v636_v21, 0.0  ;;  %v638_v27 = vadd.f32 %v625_v60, %v597_v25  ;;  %v599_v0 = vpop.f32.mrb[7].mxu0  ;;  %v766_v31 = vshll.u32 %v2358_v20, 16  ;;  %v764_v55 = vshrl.u32 %v2358_v20, 16 }
 0x178   :  { %v647_v28 = vmax.f32 %v637_v24, 0.0  ;;  %v639_v29 = vadd.f32 %v629_v62, %v599_v0  ;;  %v778_v40 = vshll.u32 %v2360_v23, 16  ;;  %v776_v61 = vshrl.u32 %v2360_v23, 16 }
 0x179   :  { %v648_v30 = vmax.f32 %v638_v27, 0.0  ;;  %v686_v41 = vmul.f32 %v670_v16, %v646_v26  ;;  %v768_v56 = vrot.slane %v766_v31, 1  ;;  %v1158_v5 = vrot.slane %v2358_v20, 1  ;;  %v2003_v26 = vld [vmem:[#allocation5 + $0x8] sm:$0xff]   ;;  %v2004_v31 = vld [vmem:[#allocation5 + $0x50] sm:$0xff]  }
 0x17a   :  { %v649_v33 = vmax.f32 %v639_v29, 0.0  ;;  %v687_v44 = vmul.f32 %v670_v16, %v647_v28  ;;  %v780_v63 = vrot.slane %v778_v40, 1  ;;  %v1161_v8 = vrot.slane %v2360_v23, 1  ;;  %v2001_v16 = vld [vmem:[#allocation5] sm:$0xff]  }
 0x17b   :  { %v688_v42 = vmul.f32 %v675_v32, %v648_v30  ;;  %v769_v10 = vor.u32 %v768_v56, %v764_v55 }
 0x17c   :  { %v689_v48 = vmul.f32 %v675_v32, %v649_v33  ;;  %v603_v49 = vpop.f32.mrb[16].mxu0  ;;  %v781_v15 = vor.u32 %v780_v63, %v776_v61  ;;  %v2008_v61 = vld [vmem:[#allocation5 + $0x60] sm:$0xff]  }
 0x17d   :  { %v2364_v51 = vpack.c.bf16 %v688_v42, %v686_v41  ;;  %v618_v52 = vadd.f32 %v603_v49, %v433_v50  ;;  %v605_v54 = vpop.f32.mrb[17].mxu0 }
 0x17e   :  { %v2367_v57 = vpack.c.bf16 %v689_v48, %v687_v44  ;;  %v619_v58 = vadd.f32 %v605_v54, %v435_v53  ;;  %v607_v59 = vpop.f32.mrb[18].mxu0  ;;  %v2005_v54 = vld [vmem:[#allocation5 + $0x10] sm:$0xff]  }
 0x17f   :  { %v640_v1 = vadd.f32 %v625_v60, %v618_v52  ;;  %v608_v2 = vpop.f32.mrb[19].mxu0  ;;  %v771_v4 = vshll.u32 %v2364_v51, 16  ;;  %v1159_v6 = vrot.slane %v2364_v51, 1  ;;  %v680_v60 = vpop.permute.xlu0 %679  ;;  %v787_v27 = vshrl.u32 %v2364_v51, 16  ;;  %v2007_v59 = vld [vmem:[#allocation5 + $0x18] sm:$0xff]  }
 0x180   :  { %v641_v50 = vadd.f32 %v629_v62, %v619_v58  ;;  %v783_v7 = vshll.u32 %v2367_v57, 16  ;;  %v1162_v9 = vrot.slane %v2367_v57, 1  ;;  %v795_v29 = vshrl.u32 %v2367_v57, 16  ;;  %v2006_v58 = vld [vmem:[#allocation5 + $0x58] sm:$0xff]  }
 0x181   :  { %v650_v53 = vmax.f32 %v640_v1, 0.0  ;;  %v773_v12 = vrot.slane %v771_v4, 1  ;;  %v2377_v13 = vsel %vm460_vm1, %v1158_v5, %v1159_v6  ;;  %v2009_v1 = vld [vmem:[#allocation5 + $0x20] sm:$0xff]   ;;  %v2010_v4 = vld [vmem:[#allocation5 + $0x68] sm:$0xff]  }
 0x182   :  { %v651_v14 = vmax.f32 %v641_v50, 0.0  ;;  %v785_v17 = vrot.slane %v783_v7, 1  ;;  %v2380_v11 = vsel %vm460_vm1, %v1161_v8, %v1162_v9  ;;  %v2011_v5 = vld [vmem:[#allocation5 + $0x28] sm:$0xff]   ;;  %v2013_v50 = vld [vmem:[#allocation5 + $0x30] sm:$0xff]   ;;  %v2014_v7 = vld [vmem:[#allocation5 + $0x78] sm:$0xff]  }
 0x183   :  { %v690_v62 = vmul.f32 %v680_v60, %v650_v53  ;;  %v774_v18 = vsel %vm124_vm0, %v769_v10, %v773_v12  ;;  %v789_v33 = vor.u32 %v787_v27, %v773_v12  ;;  %v2015_v8 = vld [vmem:[#allocation5 + $0x38] sm:$0xff]   ;;  %v2017_v53 = vld [vmem:[#allocation5 + $0x100] sm:$0xff]   ;;  %v2018_v10 = vld [vmem:[#allocation5 + $0x148] sm:$0xff]  }
 0x184   :  { %v691_v19 = vmul.f32 %v680_v60, %v651_v14  ;;  %v786_v21 = vsel %vm124_vm0, %v781_v15, %v785_v17  ;;  %v797_v42 = vor.u32 %v795_v29, %v785_v17  ;;  %v2021_v12 = vld [vmem:[#allocation5 + $0x150] sm:$0xff]   ;;  %v2024_v14 = vld [vmem:[#allocation5 + $0x158] sm:$0xff]   ;;  %v2027_v17 = vld [vmem:[#allocation5 + $0x160] sm:$0xff]  }
 0x185   :  { %v2384_v24 = vpack.c.bf16 %v690_v62, %v690_v62  ;;  %943 = vmatprep.mubr.bf16.mxu1 %v786_v21  ;;  %v2022_v60 = vld [vmem:[#allocation5 + $0x110] sm:$0xff]   ;;  %v2025_v15 = vld [vmem:[#allocation5 + $0x118] sm:$0xff]   ;;  %v2031_v62 = vld [vmem:[#allocation5 + $0x128] sm:$0xff]  }
 0x186   :  { %v2386_v25 = vpack.c.bf16 %v691_v19, %v691_v19  ;;  %944 = vmatmul.mubr.bf16.vlgmr.msra.gmra.mrb[0].mxu1 %v774_v18  ;;  %v2033_v18 = vld [vmem:[#allocation5 + $0x170] sm:$0xff]   ;;  %v2037_v19 = vld [vmem:[#allocation5 + $0x138] sm:$0xff]  }
 0x187   :  { %1728 = vmatpush3.bf16.msra.mxu1 %v2001_v16  ;;  %v791_v0 = vshll.u32 %v2384_v24, 16  ;;  %v1164_v28 = vrot.slane %v2384_v24, 1  ;;  %v803_v63 = vshrl.u32 %v2384_v24, 16  ;;  %v2036_v16 = vld [vmem:[#allocation5 + $0x178] sm:$0xff]  }
 0x188   :  { %1729 = vmatprep.subr.bf16.mxu1 %v2002_v22  ;;  %v799_v30 = vshll.u32 %v2386_v25, 16  ;;  %v1166_v32 = vrot.slane %v2386_v25, 1  ;;  %v806_v48 = vshrl.u32 %v2386_v25, 16 }
 0x189   :  { %v793_v40 = vrot.slane %v791_v0, 1  ;;  %v2397_v41 = vsel %vm460_vm1, %v1159_v6, %v1164_v28  ;;  %v2012_v6 = vld [vmem:[#allocation5 + $0x70] sm:$0xff]  }
 0x18a   :  { %v801_v44 = vrot.slane %v799_v30, 1  ;;  %v2403_v49 = vsel %vm460_vm1, %v1162_v9, %v1166_v32  ;;  %v2016_v9 = vld [vmem:[#allocation5 + $0x140] sm:$0xff]  }
 0x18b   :  { %1730 = vmatpush3.bf16.msra.mxu1 %v2003_v26  ;;  %v794_v52 = vsel %vm124_vm0, %v789_v33, %v793_v40  ;;  %v805_v2 = vor.u32 %v803_v63, %v793_v40 }
 0x18c   :  { %v802_v55 = vsel %vm124_vm0, %v797_v42, %v801_v44  ;;  %1731 = vmatprep.subr.bf16.mxu1 %v2004_v31  ;;  %v808_v56 = vor.u32 %v806_v48, %v801_v44 }
 0x18d   :  { %951 = vmatprep.mubr.bf16.mxu1 %v802_v55 }
 0x18e   :  { %952 = vmatmul.mubr.bf16.gmra.mrb[4].mxu1 %v794_v52 }
 0x18f   :  { %1732 = vmatpush3.bf16.msra.mxu1 %v2005_v54  ;;  %959 = vmatprep.mubr.bf16.mxu1 %v808_v56 }
 0x190   :  { %1733 = vmatprep.subr.bf16.mxu1 %v2006_v58 }
 0x193   :  { %1734 = vmatpush3.bf16.msra.mxu1 %v2007_v59 }
 0x194   :  { %1735 = vmatprep.subr.bf16.mxu1 %v2008_v61 }
 0x196   :  { %960 = vmatmul.mubr.bf16.gmra.mrb[8].mxu1 %v805_v2 }
 0x197   :  { %1736 = vmatpush3.bf16.msra.mxu1 %v2009_v1  ;;  %1095 = vmatprep.mubr.bf16.mxu1 %v2360_v23  ;;  %v2019_v23 = vld [vmem:[#allocation5 + $0x108] sm:$0xff]  }
 0x198   :  { %1737 = vmatprep.subr.bf16.mxu1 %v2010_v4 }
 0x19b   :  { %1738 = vmatpush3.bf16.msra.mxu1 %v2011_v5 }
 0x19c   :  { %1739 = vmatprep.subr.bf16.mxu1 %v2012_v6 }
 0x19f   :  { %1740 = vmatpush3.bf16.msra.mxu1 %v2013_v50 }
 0x1a0   :  { %1741 = vmatprep.subr.bf16.mxu1 %v2014_v7 }
 0x1a3   :  { %1742 = vmatpush3.bf16.msra.mxu1 %v2015_v8 }
 0x1a4   :  { %1761 = vmatprep.subr.bf16.mxu1 %v2016_v9 }
 0x1a6   :  { %1096 = vmatmul.mubr.bf16.vlgmr.msra.gmra.mrb[12].mxu1 %v2358_v20  ;;  %v2028_v20 = vld [vmem:[#allocation5 + $0x120] sm:$0xff]  }
 0x1a7   :  { %1103 = vmatprep.mubr.bf16.mxu1 %v2367_v57  ;;  %1762 = vmatpush3.bf16.msra.mxu1 %v2017_v53  ;;  %v2030_v57 = vld [vmem:[#allocation5 + $0x168] sm:$0xff]  }
 0x1a8   :  { %1763 = vmatprep.subr.bf16.mxu1 %v2018_v10 }
 0x1ab   :  { %1764 = vmatpush3.bf16.msra.mxu1 %v2019_v23 }
 0x1ac   :  { %1765 = vmatprep.subr.bf16.mxu1 %v2021_v12 }
 0x1ae   :  { %1104 = vmatmul.mubr.bf16.gmra.mrb[16].mxu1 %v2364_v51  ;;  %v2034_v51 = vld [vmem:[#allocation5 + $0x130] sm:$0xff]  }
 0x1af   :  { %1111 = vmatprep.mubr.bf16.mxu1 %v2386_v25  ;;  %1766 = vmatpush3.bf16.msra.mxu1 %v2022_v60 }
 0x1b0   :  { %1767 = vmatprep.subr.bf16.mxu1 %v2024_v14 }
 0x1b3   :  { %1768 = vmatpush3.bf16.msra.mxu1 %v2025_v15 }
 0x1b4   :  { %1769 = vmatprep.subr.bf16.mxu1 %v2027_v17 }
 0x1b6   :  { %1112 = vmatmul.mubr.bf16.gmra.mrb[20].mxu1 %v2384_v24 }
 0x1b7   :  { %1770 = vmatpush3.bf16.msra.mxu1 %v2028_v20  ;;  %1302 = vmatprep.mubr.bf16.mxu1 %v2380_v11  ;;  %v1689_v20 = vld [vmem:[%s2480_s6] ss:$0 sm:$0xff] }
 0x1b8   :  { %1771 = vmatprep.subr.bf16.mxu1 %v2030_v57 }
 0x1bb   :  { %1772 = vmatpush3.bf16.msra.mxu1 %v2031_v62 }
 0x1bc   :  { %1773 = vmatprep.subr.bf16.mxu1 %v2033_v18 }
 0x1bf   :  { %1774 = vmatpush3.bf16.msra.mxu1 %v2034_v51 }
 0x1c0   :  { %1775 = vmatprep.subr.bf16.mxu1 %v2036_v16 }
 0x1c3   :  { %1776 = vmatpush3.bf16.msra.mxu1 %v2037_v19 }
 0x1c4   :  { %1862 = vmatprep.subr.bf16.mxu1 %v2142_v35 }
 0x1c6   :  { %1303 = vmatmul.mubr.bf16.vlgmr.msra.gmra.mrb[24].mxu1 %v2377_v13 }
 0x1c7   :  { %1310 = vmatprep.mubr.bf16.mxu1 %v2403_v49  ;;  %1870 = vmatpush3.bf16.msra.mxu1 %v2313_v34  ;;  %v1433_v34 = vpop.f32.mrb[20].mxu0 }
 0x1c8   :  { %1863 = vmatprep.subr.bf16.mxu1 %v2142_v35 }
 0x1cb   :  { %1871 = vmatpush3.bf16.msra.mxu1 %v2318_v36  ;;  %v1831_v36 = vpop.f32.mrb[21].mxu0 }
 0x1cc   :  { %1864 = vmatprep.subr.bf16.mxu1 %v2142_v35 }
 0x1ce   :  { %1311 = vmatmul.mubr.bf16.gmra.mrb[28].mxu1 %v2397_v41 }
 0x1cf   :  { %1318 = vmatprep.mubr.bf16.mxu1 %v1166_v32  ;;  %1872 = vmatpush3.bf16.msra.mxu1 %v2322_v37  ;;  %v1436_v37 = vpop.f32.mrb[22].mxu0 }
 0x1d0   :  { %1865 = vmatprep.subr.bf16.mxu1 %v2142_v35 }
 0x1d3   :  { %1873 = vmatpush3.bf16.msra.mxu1 %v2326_v38  ;;  %v1832_v38 = vpop.f32.mrb[23].mxu0 }
 0x1d4   :  { %1866 = vmatprep.subr.bf16.mxu1 %v2142_v35 }
 0x1d6   :  { %1319 = vmatmul.mubr.bf16.gmra.mrb[32].mxu1 %v1164_v28 }
 0x1d7   :  { %1874 = vmatpush3.bf16.msra.mxu1 %v2330_v39  ;;  %1837 = vmatprep.mubr.msk.bf16.mxu1 %vm2143_vm2, %v2142_v35  ;;  %v2442_v39 = vpop.f32.mrb[24].mxu0 }
 0x1d8   :  { %1867 = vmatprep.subr.bf16.mxu1 %v2142_v35  ;;  %v1835_v13 = vpop.f32.mrb[25].mxu0 }
 0x1d9   :  { %v2444_v11 = vpop.f32.mrb[26].mxu0 }
 0x1db   :  { %1875 = vmatpush3.bf16.msra.mxu1 %v2334_v43  ;;  %v1836_v43 = vpop.f32.mrb[27].mxu0 }
 0x1dc   :  { %1868 = vmatprep.subr.bf16.mxu1 %v2142_v35 }
 0x1df   :  { %1876 = vmatpush3.bf16.msra.mxu1 %v2338_v45  ;;  %v1472_v45 = vld [vmem:[%s2481_s7] sm:$0xff] }
 0x1e0   :  { %1869 = vmatprep.subr.bf16.mxu1 %v2142_v35 }
 0x1e3   :  { %1877 = vmatpush3.bf16.msra.mxu1 %v2342_v46 }
 0x1e6   :  { %1838 = vmatmul.mubr.bf16.vlgmr.msra.gmra.mrb[36].mxu1 %v1347_v47 }
 0x1e7   :  { %1851 = vmatprep.mubr.msk.f32.mxu1 %vm1474_vm3, %v1472_v45 }
 0x259   :  { %v1709_v35 = vpop.f32.mrb[0].mxu1 }
 0x25a   :  { %v1710_v3 = vpop.f32.mrb[1].mxu1 }
 0x25b   :  { %v1711_v46 = vadd.f32 %v1710_v3, %v1709_v35  ;;  %v1712_v47 = vpop.f32.mrb[2].mxu1 }
 0x25c   :  { %v1713_v21 = vpop.f32.mrb[3].mxu1 }
 0x25d   :  { %v1714_v22 = vadd.f32 %v1713_v21, %v1712_v47 }
 0x261   :  { %v1715_v24 = vpop.f32.mrb[4].mxu1 }
 0x262   :  { %v1716_v25 = vpop.f32.mrb[5].mxu1 }
 0x263   :  { %v1717_v26 = vadd.f32 %v1716_v25, %v1715_v24  ;;  %v1718_v27 = vpop.f32.mrb[6].mxu1 }
 0x264   :  { %v1719_v0 = vpop.f32.mrb[7].mxu1 }
 0x265   :  { %v1720_v28 = vadd.f32 %v1719_v0, %v1718_v27 }
 0x269   :  { %v1721_v29 = vpop.f32.mrb[8].mxu1 }
 0x26a   :  { %v1722_v30 = vpop.f32.mrb[9].mxu1 }
 0x26b   :  { %v1723_v31 = vadd.f32 %v1722_v30, %v1721_v29  ;;  %v1724_v32 = vpop.f32.mrb[10].mxu1 }
 0x26c   :  { %v1725_v33 = vpop.f32.mrb[11].mxu1 }
 0x279   :  { %v1743_v40 = vpop.f32.mrb[12].mxu1 }
 0x27a   :  { %v1744_v41 = vpop.f32.mrb[13].mxu1 }
 0x27b   :  { %v1745_v42 = vadd.f32 %v1744_v41, %v1743_v40  ;;  %v1746_v44 = vpop.f32.mrb[14].mxu1 }
 0x27c   :  { %v1747_v48 = vpop.f32.mrb[15].mxu1 }
 0x27d   :  { %v1098_v49 = vadd.f32 %v1745_v42, %v1711_v46  ;;  %v1748_v52 = vadd.f32 %v1747_v48, %v1746_v44 }
 0x27f   :  { %v1101_v54 = vadd.f32 %v1748_v52, %v1714_v22 }
 0x281   :  { %v1749_v55 = vpop.f32.mrb[16].mxu1 }
 0x282   :  { %v1750_v56 = vpop.f32.mrb[17].mxu1 }
 0x283   :  { %v1751_v58 = vadd.f32 %v1750_v56, %v1749_v55  ;;  %v1752_v59 = vpop.f32.mrb[18].mxu1 }
 0x284   :  { %v1753_v61 = vpop.f32.mrb[19].mxu1 }
 0x285   :  { %v1106_v63 = vadd.f32 %v1751_v58, %v1717_v26  ;;  %v1754_v1 = vadd.f32 %v1753_v61, %v1752_v59 }
 0x287   :  { %v1109_v2 = vadd.f32 %v1754_v1, %v1720_v28 }
 0x289   :  { %v1755_v4 = vpop.f32.mrb[20].mxu1 }
 0x28a   :  { %v1756_v5 = vpop.f32.mrb[21].mxu1 }
 0x28b   :  { %v1757_v6 = vadd.f32 %v1756_v5, %v1755_v4  ;;  %v1758_v50 = vpop.f32.mrb[22].mxu1 }
 0x28c   :  { %v1759_v7 = vpop.f32.mrb[23].mxu1 }
 0x28d   :  { %v1114_v8 = vadd.f32 %v1757_v6, %v1723_v31 }
 0x299   :  { %v1777_v9 = vpop.f32.mrb[24].mxu1 }
 0x29a   :  { %v1778_v53 = vpop.f32.mrb[25].mxu1 }
 0x29b   :  { %v1779_v10 = vadd.f32 %v1778_v53, %v1777_v9  ;;  %v1780_v23 = vpop.f32.mrb[26].mxu1 }
 0x29c   :  { %v1781_v12 = vpop.f32.mrb[27].mxu1 }
 0x29d   :  { %v1782_v60 = vadd.f32 %v1781_v12, %v1780_v23  ;;  %v1326_v14 = vadd.f32 %v1779_v10, %v1098_v49 }
 0x29f   :  { %v1455_v15 = vadd.f32 %v1433_v34, %v1326_v14  ;;  %v1327_v17 = vadd.f32 %v1782_v60, %v1101_v54 }
 0x2a1   :  { %v1456_v57 = vadd.f32 %v1436_v37, %v1327_v17  ;;  %v1783_v62 = vpop.f32.mrb[28].mxu1  ;;  %v1467_v51 = vadd.f32 %v1689_v20, %v1455_v15 }
 0x2a2   :  { %v1784_v18 = vpop.f32.mrb[29].mxu1 }
 0x2a3   :  { %v1468_v16 = vadd.f32 %v1689_v20, %v1456_v57  ;;  %v1785_v19 = vadd.f32 %v1784_v18, %v1783_v62  ;;  %v1786_v36 = vpop.f32.mrb[30].mxu1 }
 0x2a4   :  { %v1787_v38 = vpop.f32.mrb[31].mxu1 }
 0x2a5   :  { %v1788_v13 = vadd.f32 %v1787_v38, %v1786_v36  ;;  %v1328_v43 = vadd.f32 %v1785_v19, %v1106_v63  ;;  %v1854_v45 = vpack.c.bf16 %v1468_v16, %v1467_v51 }
 0x2a7   :  { %v1457_v35 = vadd.f32 %v2442_v39, %v1328_v43  ;;  %1855 = vmatprep.subr.bf16.mxu1 %v1854_v45  ;;  %v1329_v34 = vadd.f32 %v1788_v13, %v1109_v2 }
 0x2a8   :  { %1857 = vmatpush3.bf16.msra.mxu1 %v1854_v45 }
 0x2a9   :  { %v1458_v3 = vadd.f32 %v2444_v11, %v1329_v34  ;;  %v1789_v46 = vpop.f32.mrb[32].mxu1  ;;  %v1469_v37 = vadd.f32 %v1689_v20, %v1457_v35  ;;  %v1473_v11 = vld [vmem:[%s2481_s7 + $0x8] sm:$0xff] }
 0x2aa   :  { %v1790_v47 = vpop.f32.mrb[33].mxu1 }
 0x2ab   :  { %v1470_v21 = vadd.f32 %v1689_v20, %v1458_v3  ;;  %v1791_v22 = vadd.f32 %v1790_v47, %v1789_v46  ;;  %v1792_v24 = vpop.f32.mrb[34].mxu1 }
 0x2ac   :  { %v1793_v25 = vpop.f32.mrb[35].mxu1 }
 0x2ad   :  { %v1858_v26 = vpack.c.bf16 %v1470_v21, %v1469_v37  ;;  %v1330_v27 = vadd.f32 %v1791_v22, %v1114_v8 }
 0x2af   :  { %1859 = vmatprep.subr.bf16.mxu1 %v1858_v26 }
 0x2b0   :  { %1861 = vmatpush3.bf16.msra.mxu1 %v1858_v26 }
 0x2b9   :  { %v1449_v0 = vpop.f32.mrb[36].mxu1 }
 0x2ba   :  { %v1459_v28 = vadd.f32 %v1449_v0, %v1330_v27  ;;  %v1839_v29 = vpop.f32.mrb[37].mxu1 }
 0x2bb   :  { %v1452_v39 = vpop.f32.mrb[38].mxu1 }
 0x2bc   :  { %v1471_v30 = vadd.f32 %v1689_v20, %v1459_v28  ;;  %v1840_v31 = vpop.f32.mrb[39].mxu1 }
 0x2be   :  { %1849 = vmatprep.subr.msk.mxu1 %vm1481_vm4, %v1471_v30 }
 0x2bf   :  { %1850 = vmatpush3.msk.msra.mxu1 %vm1481_vm4, %v1471_v30 }
 0x2c0   :  { %1852 = vmatmul.mubr.msk.f32.vlgmr.msra.gmra.mrb[40].mxu1 %vm1474_vm3, %v1473_v11 }
 0x393   :  { %v1853_v32 = vpop.f32.mrb[40].mxu1 }
 0x394   :  { %1561 = vst [vmem:[#allocation8 + $0x8] sm:$0xff] %v1853_v32  ;;  %v1551_v33 = vpop.f32.mrb[41].mxu1 }
 0x395   :  { %1560 = vst [vmem:[#allocation8] sm:$0xff] %v1551_v33 }
 0x396   :  { %2117 = shalt.err (!%p2114_p0)
}
 0x397   :  { %s2118_s27 = scalar_lea.hbm %s2482_s8, 256 }
 0x398   :  { %p2119_p1 = scmp.ne.s32.totalorder %s2482_s8, %s2118_s27  ;;  %p2122_p2 = scmp.lt.u32.totalorder %s2118_s27, %s2482_s8 }
 0x39a   :  { %p2124_p3 = pnand %p2122_p2, %p2119_p1 }
 0x39c   :  { %2127 = shalt.err (!%p2124_p3)
}
 0x39d   :  { %1573 = dma.vmem_to_hbm [thread:$0]  %s1568_s24, 256, %s2482_s8, [#allocation4], %s2138_s3, %s2138_s3, %s2139_s28  }
 0x39e   :  { %2132 = dma.done.wait [#allocation4], 256  }
 0x39f   :  { %2133 = vsyncadd [#allocation4], 4294967040 }
 0x3a0   :  { %1577 = vsyncpa [#allocation3], 1 }
 0x3a1   :  { %1578 = vsyncpa [#allocation6], 1 }
 0x3a2   :  { %1579 = vsyncpa [#allocation4], 1 }

</bundles_post_ra>
